<compile_context>
chip_gen: v7x
topology: tpu7x:2x2x1
jax: 0.10.0
libtpu: 0.0.40
codegen_flags: <defaults>
</compile_context>

<pallas_src>
import jax
import jax.numpy as jnp
from jax.experimental import pallas as pl
from jax.experimental.pallas import tpu as pltpu

_C1 = 0.79788456
_C2 = 0.79788456 * 0.044715  # folded constant: saves VALU multiplies


def _make_gelu_kernel(compute_dtype):
    def kernel(x_ref, o_ref):
        x = x_ref[...].astype(compute_dtype)
        x2 = x * x
        t = jnp.tanh(x * (_C1 + _C2 * x2))        # tanh -> EUP (free slot)
        o_ref[...] = (x * (0.5 + 0.5 * t)).astype(o_ref.dtype)
    return kernel


def _gelu_jnp(x, compute_dtype):
    xf = x.astype(compute_dtype)
    y = xf * 0.5 * (1.0 + jnp.tanh(_C1 * xf * (1.0 + 0.044715 * xf * xf)))
    return y.astype(x.dtype)


def _pick_compute_dtype(dtype):
    # bf16-native internals only where the VPU/EUP support bf16 (v6e / v7x);
    # v5e and older lack bf16 VALU/EUP so keep f32 internals there.
    if jnp.dtype(dtype) == jnp.dtype(jnp.bfloat16):
        try:
            kind = jax.devices()[0].device_kind.lower()
        except Exception:
            kind = ""
        if ("v6" in kind) or ("v7" in kind):
            return jnp.bfloat16
    return jnp.float32


_LANE_CANDIDATES = (32768, 16384, 8192, 4096, 2048, 1024, 512, 256, 128)


def _gelu_flat_aligned(flat, compute_dtype, target_block_bytes):
    """Pallas GELU on a flat array whose length is a multiple of 128."""
    total = flat.shape[0]
    itemsize = jnp.dtype(flat.dtype).itemsize

    # Widest lane-dense column width that divides the element count.
    C = next(c for c in _LANE_CANDIDATES if total % c == 0)
    R = total // C

    # Packed sublane multiple: 8 (f32) / 16 (bf16) / 32 (int8/fp8).
    sublane = max(8, 32 // itemsize)

    # ~8 MiB per buffer, capped so 4 buffers stay <= ~40 MiB (v7x-safe).
    tile_budget = min(target_block_bytes, 10 * 1024 * 1024)
    tm = (tile_budget // (C * itemsize)) // sublane * sublane
    tm = max(sublane, tm)
    if tm >= R:
        tm = R                      # full-extent block: always legal
        grid = (1,)
    else:
        grid = (pl.cdiv(R, tm),)    # ragged last block is elementwise-safe

    tile_bytes = tm * C * itemsize
    vmem_limit = int(min(48 * 1024 * 1024,
                         max(16 * 1024 * 1024, 4 * tile_bytes + 4 * 1024 * 1024)))

    x2d = flat.reshape(R, C)
    out2d = pl.pallas_call(
        _make_gelu_kernel(compute_dtype),
        out_shape=jax.ShapeDtypeStruct((R, C), flat.dtype),
        grid_spec=pltpu.PrefetchScalarGridSpec(
            num_scalar_prefetch=0,
            grid=grid,
            in_specs=[pl.BlockSpec((tm, C), lambda i: (i, 0))],
            out_specs=pl.BlockSpec((tm, C), lambda i: (i, 0)),
        ),
        compiler_params=pltpu.CompilerParams(
            # "parallel" is the documented megacore sharding; on v7x it splits
            # the 1-D grid across both TensorCores, no-op on v5e/v6e.
            # TODO(synk): if v7x profiling shows single-TC execution, switch
            # this axis to pltpu.CORE_PARALLEL.
            dimension_semantics=("parallel",),
            vmem_limit_bytes=vmem_limit,
        ),
        cost_estimate=pl.CostEstimate(
            flops=10 * total,
            transcendentals=total,
            bytes_accessed=2 * total * itemsize,
        ),
    )(x2d)
    return out2d.reshape(-1)


def _gelu_single_block(flat, compute_dtype):
    """One full-extent block (no tiling, no padding) for small awkward sizes."""
    total = flat.shape[0]
    x2d = flat.reshape(1, total)
    out2d = pl.pallas_call(
        _make_gelu_kernel(compute_dtype),
        out_shape=jax.ShapeDtypeStruct((1, total), flat.dtype),
    )(x2d)
    return out2d.reshape(-1)


def bloom_gelu(x, *, target_block_bytes=8 * 1024 * 1024):
    """Bloom tanh-approx GELU forward (elementwise), any shape / dtype."""
    orig_shape = x.shape
    total = x.size
    if total == 0:
        return x
    itemsize = jnp.dtype(x.dtype).itemsize
    compute_dtype = _pick_compute_dtype(x.dtype)
    flat = x.reshape(-1)

    if total % 128 == 0:
        out_flat = _gelu_flat_aligned(flat, compute_dtype, target_block_bytes)
    elif total * itemsize <= 4 * 1024 * 1024:
        # Small awkward size: single full-extent block, no pad / slice traffic.
        out_flat = _gelu_single_block(flat, compute_dtype)
    else:
        # Rare large awkward size: kernel on the 128-aligned prefix, tiny tail
        # (<128 elems) in plain XLA.  Avoids the full pad+slice round trip.
        aligned = total - (total % 128)
        head = _gelu_flat_aligned(flat[:aligned], compute_dtype, target_block_bytes)
        tail = _gelu_jnp(flat[aligned:], compute_dtype)
        out_flat = jnp.concatenate([head, tail])

    return out_flat.reshape(orig_shape)


def bloom_gelu_ref(x):
    xf = x.astype(jnp.float32)
    y = xf * 0.5 * (1.0 + jnp.tanh(0.79788456 * xf * (1.0 + 0.044715 * xf * xf)))
    return y.astype(x.dtype)


# TODO(synk): training-mode backward (bloom_gelu_back / GeLUFunction) is not
# implemented; only the inference forward pass is covered.

if __name__ == "__main__":
    key = jax.random.PRNGKey(0)
    k1, k2, k3, k4 = jax.random.split(key, 4)

    # Primary: typical BLOOM hidden-states layout at small scale (f32).
    x = jax.random.normal(k1, (2, 8, 32), dtype=jnp.float32)
    out = jax.block_until_ready(bloom_gelu(x))
    assert out.shape == x.shape and out.dtype == x.dtype
    assert jnp.allclose(out, bloom_gelu_ref(x), atol=1e-5, rtol=1e-5)

    # Multi-step grid with a ragged last row block (R=72, tm=64 at 8 MiB tiles).
    x2 = jax.random.normal(k2, (72, 64, 512), dtype=jnp.float32)
    out2 = jax.block_until_ready(bloom_gelu(x2))
    assert jnp.allclose(out2, bloom_gelu_ref(x2), atol=1e-5, rtol=1e-5)

    # bf16 input: native bf16 internals on v6e/v7x, f32 internals elsewhere.
    xb = jax.random.normal(k3, (4, 16, 128), dtype=jnp.bfloat16)
    outb = jax.block_until_ready(bloom_gelu(xb))
    assert outb.shape == xb.shape and outb.dtype == xb.dtype
    assert jnp.allclose(outb.astype(jnp.float32),
                        bloom_gelu_ref(xb).astype(jnp.float32),
                        atol=5e-2, rtol=2e-2)

    # Awkward small size (not a multiple of 128): single full-extent block.
    x3 = jax.random.normal(k4, (3, 5, 7), dtype=jnp.float32)
    out3 = jax.block_until_ready(bloom_gelu(x3))
    assert jnp.allclose(out3, bloom_gelu_ref(x3), atol=1e-5, rtol=1e-5)

    # Awkward large size (> 4 MiB, not a multiple of 128): prefix + XLA tail.
    x4 = jax.random.normal(k1, (1025, 1025), dtype=jnp.float32)
    out4 = jax.block_until_ready(bloom_gelu(x4))
    assert jnp.allclose(out4, bloom_gelu_ref(x4), atol=1e-5, rtol=1e-5)

    print("KERNEL_OK")
</pallas_src>

<mosaic_0001>
module attributes {stable_mosaic.version = 11 : i64} {
  func.func @kernel(%arg0: i32, %arg1: memref<1x512xf32, #tpu.memory_space<vmem>>, %arg2: memref<1x512xf32, #tpu.memory_space<vmem>>) attributes {dimension_semantics = [#tpu.dimension_semantics<parallel>], iteration_bounds = array<i64: 1>, scalar_prefetch = 0 : i64, scratch_operands = 0 : i64, tpu.core_type = #tpu.core_type<tc>, window_params = [{transform_indices = @transform_0, window_bounds = array<i64: 1, 512>}, {transform_indices = @transform_1, window_bounds = array<i64: 1, 512>}]} {
    %c0 = arith.constant 0 : index
    %c0_0 = arith.constant 0 : index
    %0 = vector.load %arg1[%c0, %c0_0] : memref<1x512xf32, #tpu.memory_space<vmem>>, vector<1x512xf32>
    %1 = arith.mulf %0, %0 : vector<1x512xf32>
    %cst = arith.constant 0.0356774069 : f32
    %2 = vector.broadcast %cst : f32 to vector<1x512xf32>
    %3 = arith.mulf %2, %1 : vector<1x512xf32>
    %cst_1 = arith.constant 0.797884583 : f32
    %4 = vector.broadcast %cst_1 : f32 to vector<1x512xf32>
    %5 = arith.addf %4, %3 : vector<1x512xf32>
    %6 = arith.mulf %0, %5 : vector<1x512xf32>
    %7 = math.tanh %6 : vector<1x512xf32>
    %cst_2 = arith.constant 5.000000e-01 : f32
    %8 = vector.broadcast %cst_2 : f32 to vector<1x512xf32>
    %9 = arith.mulf %8, %7 : vector<1x512xf32>
    %cst_3 = arith.constant 5.000000e-01 : f32
    %10 = vector.broadcast %cst_3 : f32 to vector<1x512xf32>
    %11 = arith.addf %10, %9 : vector<1x512xf32>
    %12 = arith.mulf %0, %11 : vector<1x512xf32>
    %c0_4 = arith.constant 0 : index
    %c0_5 = arith.constant 0 : index
    %13 = vector.load %arg2[%c0_4, %c0_5] : memref<1x512xf32, #tpu.memory_space<vmem>>, vector<1x512xf32>
    tpu.vector_store %arg2[%c0_4, %c0_5], %12 {strides = array<i32>} : memref<1x512xf32, #tpu.memory_space<vmem>>, vector<1x512xf32>,
    return
  }
  func.func @transform_0(%arg0: i32) -> (i32, i32) {
    %c0_i32 = arith.constant 0 : i32
    %c0_i32_0 = arith.constant 0 : i32
    return %arg0, %c0_i32 : i32, i32
  }
  func.func @transform_1(%arg0: i32) -> (i32, i32) {
    %c0_i32 = arith.constant 0 : i32
    %c0_i32_0 = arith.constant 0 : i32
    return %arg0, %c0_i32 : i32, i32
  }
}

</mosaic_0001>

<bundles_post_ra>
// kernel: tpu_custom_call.1
= control target key start
LH: loop header
LB: loop body
LE: loop exit
PB: predicated region body
PF: predicated region fallthrough
CT: control target
= control target key end

     0   :  { %6 = vsyncpa [#allocation3], 0  ;;  %s138_s0 = inlined_call_operand.hbm [shape: f32[1,512], index: 0, kind: input, shape index: {}]   ;;  %s139_s1 = inlined_call_operand.hbm [shape: f32[1,512], index: 1, kind: output, shape index: {}]  }
   0x1   :  { %7 = vsyncpa [#allocation4], 0  ;;  %s102_s6 = smov [#allocation2]   ;;  %s54_s10 = scalar_lea.hbm %s138_s0, 64 }
   0x2   :  { %s14_s7 = sshll.u32 %s102_s6, 4  ;;  %p55_p0 = scmp.ne.s32.totalorder %s138_s0, %s54_s10  ;;  %s15_s7 = int_to_ptr.vmem [resolvable:$true] %s14_s7 }
   0x3   :  { %p58_p1 = scmp.lt.u32.totalorder %s54_s10, %s138_s0 }
   0x5   :  { %p60_p2 = pnand %p58_p1, %p55_p0 }
   0x7   :  { %63 = shalt.err (!%p60_p2)
}
   0x8   :  { %s64_s15 = scalar_lea.vmem %s15_s7, 64  ;;  %p69_p4 = scmp.lt.s32.totalorder %s15_s7, %s15_s7 }
   0x9   :  { %p65_p3 = scmp.ne.s32.totalorder %s15_s7, %s64_s15  ;;  %p70_p5 = scmp.lt.s32.totalorder %s64_s15, %s64_s15 }
   0xb   :  { %p71_p6 = por %p70_p5, %p69_p4 }
   0xd   :  { %p72_p7 = pnand %p71_p6, %p65_p3 }
   0xf   :  { %75 = shalt.err (!%p72_p7)
}
  0x10   :  { %17 = dma.hbm_to_vmem [thread:$0]  %s138_s0, 64, %s15_s7, [#allocation3]  }
  0x11   :  { %98 = dma.done.wait [#allocation3], 64  }
  0x12   :  { %99 = vsyncadd [#allocation3], 4294967232  ;;  %v21_v0 = vld [vmem:[#allocation2] sm:$0xf]  ;;  %v30_v6 = vlaneseq  ;;  %s103_s18 = smov [#allocation5]  }
  0x13   :  { %v22_v1 = vmul.f32 %v21_v0, %v21_v0  ;;  %s41_s19 = sshll.u32 %s103_s18, 4  ;;  %s42_s19 = int_to_ptr.vmem [resolvable:$true] %s41_s19 }
  0x14   :  { %vm32_vm0 = vcmp.lt.s32.totalorder %v30_v6, 512  ;;  %s76_s20 = scalar_lea.vmem %s42_s19, 64  ;;  %p81_p9 = scmp.lt.s32.totalorder %s42_s19, %s42_s19 }
  0x15   :  { %v23_v2 = vmul.f32 0.035677407, %v22_v1  ;;  %p77_p8 = scmp.ne.s32.totalorder %s42_s19, %s76_s20  ;;  %p82_p10 = scmp.lt.s32.totalorder %s76_s20, %s76_s20 }
  0x17   :  { %v24_v3 = vadd.f32 0.7978846, %v23_v2  ;;  %p83_p11 = por %p82_p10, %p81_p9 }
  0x19   :  { %v25_v4 = vmul.f32 %v24_v3, %v21_v0  ;;  %p84_p12 = pnand %p83_p11, %p77_p8 }
  0x1b   :  { %52 = vtanh.f32 %v25_v4 }
  0x25   :  { %v53_v5 = vpop.eup %52 }
  0x26   :  { %v27_v7 = vmul.f32 0.5, %v53_v5 }
  0x28   :  { %v28_v8 = vadd.f32 0.5, %v27_v7 }
  0x2a   :  { %v29_v9 = vmul.f32 %v28_v8, %v21_v0 }
  0x2c   :  { %34 = vst.msk [vmem:[#allocation5] sm:$0xf] %vm32_vm0, %v29_v9 }
  0x2d   :  { %87 = shalt.err (!%p84_p12)
}
  0x2e   :  { %s88_s22 = scalar_lea.hbm %s139_s1, 64 }
  0x2f   :  { %p89_p13 = scmp.ne.s32.totalorder %s139_s1, %s88_s22  ;;  %p92_p0 = scmp.lt.u32.totalorder %s88_s22, %s139_s1 }
  0x31   :  { %p94_p1 = pnand %p92_p0, %p89_p13 }
  0x33   :  { %97 = shalt.err (!%p94_p1)
}
  0x34   :  { %44 = dma.vmem_to_hbm [thread:$0]  %s42_s19, 64, %s139_s1, [#allocation4]  }
  0x35   :  { %100 = dma.done.wait [#allocation4], 64  }
  0x36   :  { %101 = vsyncadd [#allocation4], 4294967232 }
  0x37   :  { %48 = vsyncpa [#allocation3], 1 }
  0x38   :  { %49 = vsyncpa [#allocation4], 1 }

</bundles_post_ra>
